<compile_context>
chip_gen: v7x
topology: tpu7x:2x2x1
jax: 0.10.0
libtpu: 0.0.40
codegen_flags: <defaults>
</compile_context>

<pallas_src>
import jax
import jax.numpy as jnp
from jax.experimental import pallas as pl
from jax.experimental.pallas import tpu as pltpu


def _round_up(x, m):
    return ((x + m - 1) // m) * m


def _patch_embed_kernel(patches_ref, w_ref, pos_ref, out_ref):
    # patches_ref: (TM, K_pad)  bf16  flattened patch rows (batch folded into M)
    # w_ref:       (K_pad, D_pad) bf16  conv weight reshaped + padded for matmul
    # pos_ref:     (TM, D_pad)  f32   (positions[1:] + conv bias), tiled to TM rows
    # out_ref:     (TM, D_pad)  f32   lane-dense, sublane-aligned output tile
    acc = jnp.dot(patches_ref[...], w_ref[...],
                  preferred_element_type=jnp.float32)
    out_ref[...] = acc + pos_ref[...]


def patch_embedding_forward(x, conv_w, conv_b, cls_token, positions, patch_size):
    """x: [B, C, H, W] (NCHW, like PyTorch). Returns [B, N+1, D] float32."""
    B, C, H, W = x.shape
    p = patch_size
    hp, wp = H // p, W // p
    N = hp * wp
    D = conv_w.shape[0]
    K = C * p * p

    # Host-side glue: extract non-overlapping p x p patches, flattened in
    # (C, ph, pw) order so they match Conv2d weight flattened as [D, C*p*p].
    # TODO(synk): fuse this patch-extraction transpose into the kernel via a
    # strided BlockSpec on the NCHW image to avoid one extra HBM round trip.
    patches = x.reshape(B, C, hp, p, wp, p)
    patches = patches.transpose(0, 2, 4, 1, 3, 5).reshape(B, N, K)

    # Padding / tiling so the MXU and stores see aligned, lane-dense tiles.
    K_pad = _round_up(K, 128)
    D_pad = _round_up(D, 128)
    N_pad = _round_up(N, 8)
    G = max(1, -(-128 // N_pad))     # images folded per grid step
    TM = G * N_pad                   # row tile: multiple of 8, >=128 when N small
    B_pad = _round_up(B, G)
    M_pad = B_pad * N_pad

    patches_p = jnp.zeros((B_pad, N_pad, K_pad), jnp.float32)
    patches_p = patches_p.at[:B, :N, :K].set(patches.astype(jnp.float32))
    patches_flat = patches_p.reshape(M_pad, K_pad).astype(jnp.bfloat16)

    w_mat = conv_w.reshape(D, K).T.astype(jnp.float32)               # [K, D]
    w_pad = jnp.zeros((K_pad, D_pad), jnp.float32).at[:K, :D].set(w_mat)
    w_pad = w_pad.astype(jnp.bfloat16)

    # Bias folded into positional rows (one fewer stream / VPU add in kernel).
    pos_pb = positions[1:].astype(jnp.float32) + conv_b.astype(jnp.float32)[None, :]
    pos_pad = jnp.zeros((N_pad, D_pad), jnp.float32).at[:N, :D].set(pos_pb)
    pos_tile = jnp.tile(pos_pad, (G, 1))                             # [TM, D_pad]

    grid = (M_pad // TM,)
    cost = pl.CostEstimate(
        flops=2 * M_pad * K_pad * D_pad,
        transcendentals=0,
        bytes_accessed=(patches_flat.size * 2 + w_pad.size * 2
                        + pos_tile.size * 4 + M_pad * D_pad * 4))

    out_flat = pl.pallas_call(
        _patch_embed_kernel,
        out_shape=jax.ShapeDtypeStruct((M_pad, D_pad), jnp.float32),
        grid_spec=pltpu.PrefetchScalarGridSpec(
            num_scalar_prefetch=0,
            grid=grid,
            in_specs=[
                pl.BlockSpec((TM, K_pad), lambda i: (i, 0)),
                pl.BlockSpec((K_pad, D_pad), lambda i: (0, 0)),
                pl.BlockSpec((TM, D_pad), lambda i: (0, 0)),
            ],
            out_specs=pl.BlockSpec((TM, D_pad), lambda i: (i, 0)),
        ),
        compiler_params=pltpu.CompilerParams(
            dimension_semantics=("parallel",)),
        cost_estimate=cost,
    )(patches_flat, w_pad, pos_tile)

    emb = out_flat.reshape(B_pad, N_pad, D_pad)[:B, :N, :D]

    # cls row handled outside the kernel -> kernel stores stay sublane-aligned.
    cls_row = (cls_token.reshape(1, D).astype(jnp.float32)
               + positions[0:1, :].astype(jnp.float32))              # [1, D]
    cls_rows = jnp.broadcast_to(cls_row[None], (B, 1, D))
    return jnp.concatenate([cls_rows, emb], axis=1)


def vision_transformer_forward(x, params, patch_size):
    """Mirrors VisionTransformer.forward: returns the embedded seq and its shape."""
    emb = patch_embedding_forward(
        x, params["conv_w"], params["conv_b"],
        params["cls_token"], params["positions"], patch_size)
    return emb, emb.shape


def _reference(x, params, patch_size):
    """Pure-JAX f32 reference for correctness checking."""
    B, C, H, W = x.shape
    p = patch_size
    hp, wp = H // p, W // p
    N = hp * wp
    D = params["conv_w"].shape[0]
    K = C * p * p
    patches = x.reshape(B, C, hp, p, wp, p).transpose(0, 2, 4, 1, 3, 5).reshape(B, N, K)
    emb = patches @ params["conv_w"].reshape(D, K).T + params["conv_b"][None, None, :]
    cls = jnp.broadcast_to(params["cls_token"].reshape(1, 1, D), (B, 1, D))
    seq = jnp.concatenate([cls, emb], axis=1) + params["positions"][None]
    return seq


if __name__ == "__main__":
    # Small-shape config consistent with the module: in_channels is fixed at 3.
    img_size, patch_size, emb_dim = 16, 4, 32
    B, C = 2, 3
    N = (img_size // patch_size) ** 2  # 16 patches

    key = jax.random.PRNGKey(0)
    k_x, k_w, k_b, k_cls, k_pos = jax.random.split(key, 5)

    x = jax.random.normal(k_x, (B, C, img_size, img_size), dtype=jnp.float32)
    params = {
        # Conv2d(3, emb_dim, kernel_size=p, stride=p): weight [D, C, p, p], bias [D]
        "conv_w": jax.random.normal(k_w, (emb_dim, C, patch_size, patch_size),
                                    dtype=jnp.float32) * 0.02,
        "conv_b": jax.random.normal(k_b, (emb_dim,), dtype=jnp.float32) * 0.02,
        # cls_token ~ torch.rand(1,1,D), positions ~ torch.randn(N+1, D)
        "cls_token": jax.random.uniform(k_cls, (1, 1, emb_dim), dtype=jnp.float32),
        "positions": jax.random.normal(k_pos, (N + 1, emb_dim), dtype=jnp.float32),
    }

    emb, shape = vision_transformer_forward(x, params, patch_size)
    jax.block_until_ready(emb)

    ref = _reference(x, params, patch_size)
    assert emb.shape == (B, N + 1, emb_dim), emb.shape
    assert shape == (B, N + 1, emb_dim)
    # bf16 matmul operands (f32 accumulate) -> slightly looser tolerance vs f32 ref.
    assert jnp.allclose(emb, ref, atol=2e-2, rtol=2e-2), "mismatch vs reference"

    print("KERNEL_OK")
</pallas_src>

<mosaic_0001>
module attributes {stable_mosaic.version = 11 : i64} {
  func.func @_patch_embed_kernel(%arg0: i32, %arg1: memref<128x128xbf16, #tpu.memory_space<vmem>>, %arg2: memref<128x128xbf16, #tpu.memory_space<vmem>>, %arg3: memref<128x128xf32, #tpu.memory_space<vmem>>, %arg4: memref<128x128xf32, #tpu.memory_space<vmem>>) attributes {dimension_semantics = [#tpu.dimension_semantics<parallel>], iteration_bounds = array<i64: 1>, scalar_prefetch = 0 : i64, scratch_operands = 0 : i64, tpu.core_type = #tpu.core_type<tc>, window_params = [{transform_indices = @transform_0, window_bounds = array<i64: 128, 128>}, {pipeline_mode = #tpu.pipeline_mode<synchronous>, transform_indices = @transform_1, window_bounds = array<i64: 128, 128>}, {pipeline_mode = #tpu.pipeline_mode<synchronous>, transform_indices = @transform_2, window_bounds = array<i64: 128, 128>}, {transform_indices = @transform_3, window_bounds = array<i64: 128, 128>}]} {
    %c0 = arith.constant 0 : index
    %c0_0 = arith.constant 0 : index
    %0 = vector.load %arg1[%c0, %c0_0] : memref<128x128xbf16, #tpu.memory_space<vmem>>, vector<128x128xbf16>
    %c0_1 = arith.constant 0 : index
    %c0_2 = arith.constant 0 : index
    %1 = vector.load %arg2[%c0_1, %c0_2] : memref<128x128xbf16, #tpu.memory_space<vmem>>, vector<128x128xbf16>
    %cst = arith.constant dense<0.000000e+00> : vector<128x128xf32>
    %2 = tpu.matmul %0, %1, %cst {dimension_numbers = #tpu.dot_dimension_numbers<[1], [0], [0], [1], [0, 0, 1, 1], [], []>} : vector<128x128xbf16>, vector<128x128xbf16>, vector<128x128xf32> -> vector<128x128xf32>
    %c0_3 = arith.constant 0 : index
    %c0_4 = arith.constant 0 : index
    %3 = vector.load %arg3[%c0_3, %c0_4] : memref<128x128xf32, #tpu.memory_space<vmem>>, vector<128x128xf32>
    %4 = arith.addf %2, %3 : vector<128x128xf32>
    %c0_5 = arith.constant 0 : index
    %c0_6 = arith.constant 0 : index
    %5 = vector.load %arg4[%c0_5, %c0_6] : memref<128x128xf32, #tpu.memory_space<vmem>>, vector<128x128xf32>
    tpu.vector_store %arg4[%c0_5, %c0_6], %4 {strides = array<i32>} : memref<128x128xf32, #tpu.memory_space<vmem>>, vector<128x128xf32>,
    return
  }
  func.func @transform_0(%arg0: i32) -> (i32, i32) {
    %c0_i32 = arith.constant 0 : i32
    %c0_i32_0 = arith.constant 0 : i32
    return %arg0, %c0_i32 : i32, i32
  }
  func.func @transform_1(%arg0: i32) -> (i32, i32) {
    %c0_i32 = arith.constant 0 : i32
    %c0_i32_0 = arith.constant 0 : i32
    %c0_i32_1 = arith.constant 0 : i32
    return %c0_i32, %c0_i32_0 : i32, i32
  }
  func.func @transform_2(%arg0: i32) -> (i32, i32) {
    %c0_i32 = arith.constant 0 : i32
    %c0_i32_0 = arith.constant 0 : i32
    %c0_i32_1 = arith.constant 0 : i32
    return %c0_i32, %c0_i32_0 : i32, i32
  }
  func.func @transform_3(%arg0: i32) -> (i32, i32) {
    %c0_i32 = arith.constant 0 : i32
    %c0_i32_0 = arith.constant 0 : i32
    return %arg0, %c0_i32 : i32, i32
  }
}

</mosaic_0001>

<bundles_post_ra>
// kernel: tpu_custom_call.1
= control target key start
LH: loop header
LB: loop body
LE: loop exit
PB: predicated region body
PF: predicated region fallthrough
CT: control target
= control target key end

     0   :  { %8 = vsyncpa [#allocation3], 0  ;;  %s619_s0 = inlined_call_operand.hbm [shape: bf16[128,128], index: 0, kind: input, shape index: {}]   ;;  %s620_s1 = inlined_call_operand.hbm [shape: bf16[128,128], index: 1, kind: input, shape index: {}]   ;;  %s621_s2 = inlined_call_operand.hbm [shape: f32[128,128], index: 2, kind: input, shape index: {}]   ;;  %s622_s3 = inlined_call_operand.hbm [shape: f32[128,128], index: 3, kind: output, shape index: {}]  }
   0x1   :  { %9 = vsyncpa [#allocation6], 0 }
   0x2   :  { %10 = vsyncpa [#allocation4], 0  ;;  %s530_s12 = smov [#allocation5]   ;;  %s531_s14 = smov [#allocation2]  }
   0x3   :  { %s28_s13 = sshll.u32 %s530_s12, 4  ;;  %s16_s15 = sshll.u32 %s531_s14, 4  ;;  %s29_s13 = int_to_ptr.vmem [resolvable:$true] %s28_s13  ;;  %s558_s15 = int_to_ptr.vmem [resolvable:$true] %s16_s15 }
   0x4   :  { %s436_s18 = scalar_lea.hbm %s620_s1, 1024 }
   0x5   :  { %p437_p0 = scmp.ne.s32.totalorder %s620_s1, %s436_s18  ;;  %p440_p1 = scmp.lt.u32.totalorder %s436_s18, %s620_s1 }
   0x7   :  { %p442_p2 = pnand %p440_p1, %p437_p0 }
   0x9   :  { %445 = shalt.err (!%p442_p2)
}
   0xa   :  { %s446_s23 = scalar_lea.vmem %s29_s13, 1024  ;;  %p451_p4 = scmp.lt.s32.totalorder %s29_s13, %s29_s13 }
   0xb   :  { %p447_p3 = scmp.ne.s32.totalorder %s29_s13, %s446_s23  ;;  %p452_p5 = scmp.lt.s32.totalorder %s446_s23, %s446_s23 }
   0xd   :  { %p453_p6 = por %p452_p5, %p451_p4 }
   0xf   :  { %p454_p7 = pnand %p453_p6, %p447_p3 }
  0x11   :  { %457 = shalt.err (!%p454_p7)
}
  0x12   :  { %s532_s24 = smov 64   ;;  %s533_s25 = smov 4  }
  0x13   :  { %34 = dma.hbm_to_vmem [thread:$0]  %s620_s1, 1024, %s29_s13, [#allocation6], %s532_s24, %s532_s24, %s533_s25  }
  0x14   :  { %s458_s30 = scalar_lea.hbm %s619_s0, 1024 }
  0x15   :  { %p459_p8 = scmp.ne.s32.totalorder %s619_s0, %s458_s30  ;;  %p462_p9 = scmp.lt.u32.totalorder %s458_s30, %s619_s0 }
  0x17   :  { %p464_p10 = pnand %p462_p9, %p459_p8 }
  0x19   :  { %467 = shalt.err (!%p464_p10)
}
  0x1a   :  { %s468_s8 = scalar_lea.vmem %s558_s15, 1024  ;;  %p473_p12 = scmp.lt.s32.totalorder %s558_s15, %s558_s15 }
  0x1b   :  { %p469_p11 = scmp.ne.s32.totalorder %s558_s15, %s468_s8  ;;  %p474_p13 = scmp.lt.s32.totalorder %s468_s8, %s468_s8 }
  0x1d   :  { %p475_p0 = por %p474_p13, %p473_p12 }
  0x1f   :  { %p476_p1 = pnand %p475_p0, %p469_p11 }
  0x21   :  { %479 = shalt.err (!%p476_p1)
}
  0x22   :  { %22 = dma.hbm_to_vmem [thread:$0]  %s619_s0, 1024, %s558_s15, [#allocation3], %s532_s24, %s532_s24, %s533_s25  }
  0x23   :  { %s534_s10 = smov [#allocation7]   ;;  %s480_s14 = scalar_lea.hbm %s621_s2, 2048 }
  0x24   :  { %s40_s11 = sshll.u32 %s534_s10, 4  ;;  %p481_p2 = scmp.ne.s32.totalorder %s621_s2, %s480_s14  ;;  %s41_s11 = int_to_ptr.vmem [resolvable:$true] %s40_s11 }
  0x25   :  { %p484_p3 = scmp.lt.u32.totalorder %s480_s14, %s621_s2 }
  0x27   :  { %p486_p4 = pnand %p484_p3, %p481_p2 }
  0x29   :  { %489 = shalt.err (!%p486_p4)
}
  0x2a   :  { %s490_s20 = scalar_lea.vmem %s41_s11, 2048  ;;  %p495_p6 = scmp.lt.s32.totalorder %s41_s11, %s41_s11 }
  0x2b   :  { %p491_p5 = scmp.ne.s32.totalorder %s41_s11, %s490_s20  ;;  %p496_p7 = scmp.lt.s32.totalorder %s490_s20, %s490_s20 }
  0x2d   :  { %p497_p8 = por %p496_p7, %p495_p6 }
  0x2f   :  { %p498_p9 = pnand %p497_p8, %p491_p5 }
  0x31   :  { %501 = shalt.err (!%p498_p9)
}
  0x32   :  { %s535_s0 = smov 128   ;;  %s536_s15 = smov 8  }
  0x33   :  { %46 = dma.hbm_to_vmem [thread:$0]  %s621_s2, 2048, %s41_s11, [#allocation6], %s535_s0, %s535_s0, %s536_s15  }
  0x34   :  { %524 = dma.done.wait [#allocation3], 1024  }
  0x35   :  { %525 = vsyncadd [#allocation3], 4294966272 }
  0x36   :  { %526 = dma.done.wait [#allocation6], 3072  }
  0x37   :  { %527 = vsyncadd [#allocation6], 4294964224  ;;  %v420_v0 = vld [vmem:[#allocation5] sm:$0xff]   ;;  %v421_v1 = vld [vmem:[#allocation5 + $0x8] sm:$0xff]   ;;  %s537_s2 = smov [#allocation8]  }
  0x38   :  { %364 = vmatprep.subr.bf16.mxu0 %v420_v0  ;;  %396 = vmatprep.subr.bf16.mxu1 %v420_v0  ;;  %v422_v2 = vld [vmem:[#allocation5 + $0x10] sm:$0xff]   ;;  %v423_v3 = vld [vmem:[#allocation5 + $0x18] sm:$0xff]   ;;  %v428_v4 = vld [vmem:[#allocation2] sm:$0xff]   ;;  %s319_s23 = sshll.u32 %s537_s2, 4  ;;  %s320_s23 = int_to_ptr.vmem [resolvable:$true] %s319_s23 }
  0x39   :  { %365 = vmatpush3.bf16.msra.mxu0 %v420_v0  ;;  %404 = vmatpush3.bf16.msra.mxu1 %v420_v0  ;;  %v429_v5 = vld [vmem:[#allocation2 + $0x20] sm:$0xff]   ;;  %v425_v7 = vld [vmem:[#allocation5 + $0x28] sm:$0xff]   ;;  %v426_v8 = vld [vmem:[#allocation5 + $0x30] sm:$0xff]   ;;  %s502_s24 = scalar_lea.vmem %s320_s23, 2048  ;;  %p507_p11 = scmp.lt.s32.totalorder %s320_s23, %s320_s23 }
  0x3a   :  { %366 = vmatprep.subr.bf16.mxu0 %v421_v1  ;;  %397 = vmatprep.subr.bf16.mxu1 %v421_v1  ;;  %v424_v6 = vld [vmem:[#allocation5 + $0x20] sm:$0xff]   ;;  %v427_v9 = vld [vmem:[#allocation5 + $0x38] sm:$0xff]   ;;  %v430_v10 = vld [vmem:[#allocation2 + $0x8] sm:$0xff]   ;;  %p503_p10 = scmp.ne.s32.totalorder %s320_s23, %s502_s24  ;;  %p508_p12 = scmp.lt.s32.totalorder %s502_s24, %s502_s24 }
  0x3b   :  { %380 = vmatprep.mubr.bf16.mxu0 %v428_v4  ;;  %388 = vmatprep.mubr.bf16.mxu1 %v429_v5  ;;  %v431_v11 = vld [vmem:[#allocation2 + $0x28] sm:$0xff]   ;;  %v432_v12 = vld [vmem:[#allocation2 + $0x10] sm:$0xff]   ;;  %v434_v14 = vld [vmem:[#allocation2 + $0x18] sm:$0xff]  }
  0x3c   :  { %v433_v13 = vld [vmem:[#allocation2 + $0x30] sm:$0xff]   ;;  %v435_v15 = vld [vmem:[#allocation2 + $0x38] sm:$0xff]   ;;  %v89_v18 = vld [vmem:[#allocation7] sm:$0xff]  ;;  %p509_p13 = por %p508_p12, %p507_p11 }
  0x3d   :  { %367 = vmatpush3.bf16.msra.mxu0 %v421_v1  ;;  %405 = vmatpush3.bf16.msra.mxu1 %v421_v1  ;;  %v91_v16 = vld [vmem:[#allocation7 + $0x10] sm:$0xff]  ;;  %v97_v19 = vld [vmem:[#allocation7 + $0x40] sm:$0xff]  ;;  %v92_v22 = vld [vmem:[#allocation7 + $0x18] sm:$0xff] }
  0x3e   :  { %368 = vmatprep.subr.bf16.mxu0 %v422_v2  ;;  %398 = vmatprep.subr.bf16.mxu1 %v422_v2  ;;  %v99_v17 = vld [vmem:[#allocation7 + $0x50] sm:$0xff]  ;;  %v100_v23 = vld [vmem:[#allocation7 + $0x58] sm:$0xff]  ;;  %v90_v28 = vld [vmem:[#allocation7 + $0x8] sm:$0xff]  ;;  %p510_p0 = pnand %p509_p13, %p503_p10 }
  0x3f   :  { %v98_v29 = vld [vmem:[#allocation7 + $0x48] sm:$0xff]  ;;  %v95_v40 = vld [vmem:[#allocation7 + $0x30] sm:$0xff]  ;;  %v93_v42 = vld [vmem:[#allocation7 + $0x20] sm:$0xff] }
  0x40   :  { %v103_v41 = vld [vmem:[#allocation7 + $0x70] sm:$0xff]  ;;  %v101_v43 = vld [vmem:[#allocation7 + $0x60] sm:$0xff]  ;;  %v96_v46 = vld [vmem:[#allocation7 + $0x38] sm:$0xff] }
  0x41   :  { %369 = vmatpush3.bf16.msra.mxu0 %v422_v2  ;;  %406 = vmatpush3.bf16.msra.mxu1 %v422_v2  ;;  %v104_v47 = vld [vmem:[#allocation7 + $0x78] sm:$0xff]  ;;  %v94_v52 = vld [vmem:[#allocation7 + $0x28] sm:$0xff] }
  0x42   :  { %370 = vmatprep.subr.bf16.mxu0 %v423_v3  ;;  %399 = vmatprep.subr.bf16.mxu1 %v423_v3  ;;  %v102_v53 = vld [vmem:[#allocation7 + $0x68] sm:$0xff] }
  0x45   :  { %371 = vmatpush3.bf16.msra.mxu0 %v423_v3  ;;  %407 = vmatpush3.bf16.msra.mxu1 %v423_v3 }
  0x46   :  { %372 = vmatprep.subr.bf16.mxu0 %v424_v6  ;;  %400 = vmatprep.subr.bf16.mxu1 %v424_v6 }
  0x49   :  { %373 = vmatpush3.bf16.msra.mxu0 %v424_v6  ;;  %408 = vmatpush3.bf16.msra.mxu1 %v424_v6 }
  0x4a   :  { %374 = vmatprep.subr.bf16.mxu0 %v425_v7  ;;  %401 = vmatprep.subr.bf16.mxu1 %v425_v7 }
  0x4d   :  { %375 = vmatpush3.bf16.msra.mxu0 %v425_v7  ;;  %409 = vmatpush3.bf16.msra.mxu1 %v425_v7 }
  0x4e   :  { %376 = vmatprep.subr.bf16.mxu0 %v426_v8  ;;  %402 = vmatprep.subr.bf16.mxu1 %v426_v8 }
  0x51   :  { %377 = vmatpush3.bf16.msra.mxu0 %v426_v8  ;;  %410 = vmatpush3.bf16.msra.mxu1 %v426_v8 }
  0x52   :  { %378 = vmatprep.subr.bf16.mxu0 %v427_v9  ;;  %403 = vmatprep.subr.bf16.mxu1 %v427_v9 }
  0x55   :  { %379 = vmatpush3.bf16.msra.mxu0 %v427_v9  ;;  %411 = vmatpush3.bf16.msra.mxu1 %v427_v9 }
  0x58   :  { %381 = vmatmul.mubr.bf16.vlgmr.msra.gmra.mrb[0].mxu0 %v430_v10  ;;  %389 = vmatmul.mubr.bf16.vlgmr.msra.gmra.mrb[0].mxu1 %v431_v11 }
  0x59   :  { %384 = vmatprep.mubr.bf16.mxu0 %v432_v12  ;;  %392 = vmatprep.mubr.bf16.mxu1 %v433_v13 }
  0x60   :  { %385 = vmatmul.mubr.bf16.gmra.mrb[4].mxu0 %v434_v14  ;;  %393 = vmatmul.mubr.bf16.gmra.mrb[4].mxu1 %v435_v15 }
 0x12b   :  { %v382_v20 = vpop.f32.mrb[0].mxu0  ;;  %v390_v21 = vpop.f32.mrb[0].mxu1 }
 0x12c   :  { %v244_v24 = vadd.f32 %v382_v20, %v91_v16  ;;  %v276_v25 = vadd.f32 %v390_v21, %v99_v17  ;;  %v235_v26 = vpop.f32.mrb[1].mxu0  ;;  %v267_v27 = vpop.f32.mrb[1].mxu1 }
 0x12d   :  { %v236_v30 = vadd.f32 %v235_v26, %v89_v18  ;;  %v268_v31 = vadd.f32 %v267_v27, %v97_v19  ;;  %v383_v32 = vpop.f32.mrb[2].mxu0  ;;  %v391_v33 = vpop.f32.mrb[2].mxu1 }
 0x12e   :  { %300 = vst [vmem:[#allocation8 + $0x10] sm:$0xff] %v244_v24  ;;  %308 = vst [vmem:[#allocation8 + $0x50] sm:$0xff] %v276_v25  ;;  %v247_v34 = vadd.f32 %v383_v32, %v92_v22  ;;  %v279_v35 = vadd.f32 %v391_v33, %v100_v23  ;;  %v238_v36 = vpop.f32.mrb[3].mxu0  ;;  %v270_v37 = vpop.f32.mrb[3].mxu1 }
 0x12f   :  { %298 = vst [vmem:[#allocation8] sm:$0xff] %v236_v30  ;;  %306 = vst [vmem:[#allocation8 + $0x40] sm:$0xff] %v268_v31  ;;  %v239_v38 = vadd.f32 %v238_v36, %v90_v28  ;;  %v271_v39 = vadd.f32 %v270_v37, %v98_v29 }
 0x130   :  { %301 = vst [vmem:[#allocation8 + $0x18] sm:$0xff] %v247_v34  ;;  %309 = vst [vmem:[#allocation8 + $0x58] sm:$0xff] %v279_v35 }
 0x131   :  { %299 = vst [vmem:[#allocation8 + $0x8] sm:$0xff] %v239_v38  ;;  %307 = vst [vmem:[#allocation8 + $0x48] sm:$0xff] %v271_v39 }
 0x133   :  { %v386_v44 = vpop.f32.mrb[4].mxu0  ;;  %v394_v45 = vpop.f32.mrb[4].mxu1 }
 0x134   :  { %v260_v48 = vadd.f32 %v386_v44, %v95_v40  ;;  %v292_v49 = vadd.f32 %v394_v45, %v103_v41  ;;  %v251_v50 = vpop.f32.mrb[5].mxu0  ;;  %v283_v51 = vpop.f32.mrb[5].mxu1 }
 0x135   :  { %v252_v54 = vadd.f32 %v251_v50, %v93_v42  ;;  %v284_v55 = vadd.f32 %v283_v51, %v101_v43  ;;  %v387_v56 = vpop.f32.mrb[6].mxu0  ;;  %v395_v57 = vpop.f32.mrb[6].mxu1 }
 0x136   :  { %304 = vst [vmem:[#allocation8 + $0x30] sm:$0xff] %v260_v48  ;;  %312 = vst [vmem:[#allocation8 + $0x70] sm:$0xff] %v292_v49  ;;  %v263_v58 = vadd.f32 %v387_v56, %v96_v46  ;;  %v295_v59 = vadd.f32 %v395_v57, %v104_v47  ;;  %v254_v60 = vpop.f32.mrb[7].mxu0  ;;  %v286_v61 = vpop.f32.mrb[7].mxu1 }
 0x137   :  { %302 = vst [vmem:[#allocation8 + $0x20] sm:$0xff] %v252_v54  ;;  %310 = vst [vmem:[#allocation8 + $0x60] sm:$0xff] %v284_v55  ;;  %v255_v62 = vadd.f32 %v254_v60, %v94_v52  ;;  %v287_v63 = vadd.f32 %v286_v61, %v102_v53 }
 0x138   :  { %305 = vst [vmem:[#allocation8 + $0x38] sm:$0xff] %v263_v58  ;;  %313 = vst [vmem:[#allocation8 + $0x78] sm:$0xff] %v295_v59 }
 0x139   :  { %303 = vst [vmem:[#allocation8 + $0x28] sm:$0xff] %v255_v62  ;;  %311 = vst [vmem:[#allocation8 + $0x68] sm:$0xff] %v287_v63 }
 0x13a   :  { %513 = shalt.err (!%p510_p0)
}
 0x13b   :  { %s514_s27 = scalar_lea.hbm %s622_s3, 2048 }
 0x13c   :  { %p515_p1 = scmp.ne.s32.totalorder %s622_s3, %s514_s27  ;;  %p518_p2 = scmp.lt.u32.totalorder %s514_s27, %s622_s3 }
 0x13e   :  { %p520_p3 = pnand %p518_p2, %p515_p1 }
 0x140   :  { %523 = shalt.err (!%p520_p3)
}
 0x141   :  { %325 = dma.vmem_to_hbm [thread:$0]  %s320_s23, 2048, %s622_s3, [#allocation4], %s535_s0, %s535_s0, %s536_s15  }
 0x142   :  { %528 = dma.done.wait [#allocation4], 2048  }
 0x143   :  { %529 = vsyncadd [#allocation4], 4294965248 }
 0x144   :  { %329 = vsyncpa [#allocation3], 1 }
 0x145   :  { %330 = vsyncpa [#allocation6], 1 }
 0x146   :  { %331 = vsyncpa [#allocation4], 1 }

</bundles_post_ra>
